<compile_context>
chip_gen: v6e
topology: v6e:2x2x1
jax: 0.10.0
libtpu: 0.0.40
codegen_flags: <defaults>
</compile_context>

<pallas_src>
import jax
import jax.numpy as jnp
from jax.experimental import pallas as pl
from jax.experimental.pallas import tpu as pltpu

BN_EPS = 1e-5


def critic_kernel(state_ref, action_ref,
                  w1_ref, gamma_ref, beta_ref,
                  w2s_ref, w2a_ref, b2_ref,
                  w3_ref, b3_ref,
                  out_ref):
    e = pl.program_id(0)                  # which (weights, batch) evaluation
    state = state_ref[0]                  # (B, S) f32
    action = action_ref[0]                # (B, A) f32

    # fcs1: bf16 operands on the MXU, f32 accumulation.  Linear bias b1 is
    # intentionally omitted — training-mode BN's mean subtraction cancels any
    # per-column constant, so it is mathematically dead here.
    h1 = jnp.dot(state.astype(jnp.bfloat16), w1_ref[0],
                 preferred_element_type=jnp.float32)        # (B, H1) f32

    # BatchNorm1d (training mode, biased batch stats), centered two-pass
    # variance, folded into one mul + add on the (B, H1) tile.
    mean = jnp.mean(h1, axis=0, keepdims=True)
    d = h1 - mean
    var = jnp.mean(d * d, axis=0, keepdims=True)
    scale = gamma_ref[0] * jax.lax.rsqrt(var + BN_EPS)       # rsqrt -> EUP slot
    xs = jnp.maximum(d * scale + beta_ref[0], 0.0)           # relu, f32 VPU math

    # fc2 on concat([xs, action]) == xs @ W2s + action @ W2a (concat folded away)
    h2 = (jnp.dot(xs.astype(jnp.bfloat16), w2s_ref[0],
                  preferred_element_type=jnp.float32)
          + jnp.dot(action.astype(jnp.bfloat16), w2a_ref[0],
                    preferred_element_type=jnp.float32)
          + b2_ref[0])
    h2 = jnp.maximum(h2, 0.0)                                 # relu

    # fc3 (out-dim 1): VPU multiply + XLU lane reduction instead of an N=1 MXU
    # matmul; w3 stays f32 in PyTorch's (1, H2) layout, b3 is an SMEM scalar.
    q = jnp.sum(h2 * w3_ref[0], axis=-1, keepdims=True)      # (B, 1)
    out_ref[0] = q + b3_ref[e]


def critic_forward(states, actions, kparams):
    """Fused Critic forward over E stacked evaluations.

    states:  (E, B, S) f32     actions: (E, B, A) f32
    kparams: output of stack_kernel_params([...]) — one weight set per eval.
    Returns (E, B, 1) f32 Q-values.  Stack local + target critic evaluations of
    a training step into one call to amortize launch/DMA overhead (and to use
    both TensorCores on v7x).
    """
    E, B, S = states.shape
    A = actions.shape[-1]
    H1 = kparams["w1"].shape[-1]
    H2 = kparams["w2s"].shape[-1]

    def vspec(shape):
        # One eval per grid step; block == per-eval slab (resident in VMEM).
        return pl.BlockSpec((1,) + shape, lambda e, _s=shape: (e,) + (0,) * len(_s))

    in_specs = [
        vspec((B, S)),            # state
        vspec((B, A)),            # action
        vspec((S, H1)),           # w1   (bf16)
        vspec((1, H1)),           # gamma
        vspec((1, H1)),           # beta
        vspec((H1, H2)),          # w2s  (bf16)
        vspec((A, H2)),           # w2a  (bf16)
        vspec((1, H2)),           # b2
        vspec((1, H2)),           # w3
        pl.BlockSpec(memory_space=pltpu.MemorySpace.SMEM),   # b3 scalar table
    ]

    return pl.pallas_call(
        critic_kernel,
        out_shape=jax.ShapeDtypeStruct((E, B, 1), jnp.float32),
        grid=(E,),
        in_specs=in_specs,
        out_specs=vspec((B, 1)),
        compiler_params=pltpu.CompilerParams(
            dimension_semantics=("parallel",)),   # shard evals across TCs (v7x)
    )(states, actions,
      kparams["w1"], kparams["gamma"], kparams["beta"],
      kparams["w2s"], kparams["w2a"], kparams["b2"],
      kparams["w3"], kparams["b3"])


def init_params(key, state_size, action_size, fcs1_units, fc2_units):
    """f32 master parameters mirroring the PyTorch module's reset_weights().
    Note: hidden_init() uses weight.size(0) (= out_features) as 'fan_in'."""
    ks = jax.random.split(key, 6)
    lim1 = 1.0 / float(fcs1_units) ** 0.5          # hidden_init(fcs1)
    lim2 = 1.0 / float(fc2_units) ** 0.5           # hidden_init(fc2)
    blim1 = 1.0 / float(state_size) ** 0.5         # default PyTorch bias init
    blim2 = 1.0 / float(fcs1_units + action_size) ** 0.5
    blim3 = 1.0 / float(fc2_units) ** 0.5
    return {
        "w1": jax.random.uniform(ks[0], (state_size, fcs1_units), jnp.float32, -lim1, lim1),
        "b1": jax.random.uniform(ks[1], (1, fcs1_units), jnp.float32, -blim1, blim1),
        "gamma": jnp.ones((1, fcs1_units), jnp.float32),   # BatchNorm1d weight init
        "beta": jnp.zeros((1, fcs1_units), jnp.float32),   # BatchNorm1d bias init
        "w2": jax.random.uniform(ks[2], (fcs1_units + action_size, fc2_units),
                                 jnp.float32, -lim2, lim2),
        "b2": jax.random.uniform(ks[3], (1, fc2_units), jnp.float32, -blim2, blim2),
        "w3": jax.random.uniform(ks[4], (1, fc2_units), jnp.float32, -0.003, 0.003),
        "b3": jax.random.uniform(ks[5], (1,), jnp.float32, -blim3, blim3),
    }


def stack_kernel_params(param_list):
    """Convert a list of per-eval f32 parameter dicts into the kernel layout:
      * w1 and the (state|action) split of w2 are cast to bf16 (halves weight
        DMA; native MXU operand dtype),
      * b1 is dropped (dead under training-mode BatchNorm),
      * small per-column vectors stay f32 (no bf16 VPU on v5e),
      * b3 becomes an (E,) SMEM scalar table."""
    H1 = param_list[0]["w1"].shape[1]

    def stack(fn):
        return jnp.stack([fn(p) for p in param_list])

    return {
        "w1": stack(lambda p: p["w1"].astype(jnp.bfloat16)),
        "gamma": stack(lambda p: p["gamma"]),
        "beta": stack(lambda p: p["beta"]),
        "w2s": stack(lambda p: p["w2"][:H1, :].astype(jnp.bfloat16)),
        "w2a": stack(lambda p: p["w2"][H1:, :].astype(jnp.bfloat16)),
        "b2": stack(lambda p: p["b2"]),
        "w3": stack(lambda p: p["w3"]),
        "b3": jnp.concatenate([p["b3"] for p in param_list]),   # (E,)
    }


def reference_forward(state, action, p, dot_dtype=jnp.float32):
    """Pure-JAX reference matching the PyTorch module (b1 included; its
    cancellation by training-mode BN validates dropping it in the kernel).
    dot_dtype=bfloat16 mirrors the kernel's mixed-precision matmuls."""
    h1 = jnp.dot(state.astype(dot_dtype), p["w1"].astype(dot_dtype),
                 preferred_element_type=jnp.float32) + p["b1"]
    mean = h1.mean(axis=0, keepdims=True)
    d = h1 - mean
    var = (d * d).mean(axis=0, keepdims=True)
    xs = jnp.maximum(d * jax.lax.rsqrt(var + BN_EPS) * p["gamma"] + p["beta"], 0.0)
    x = jnp.concatenate([xs, action], axis=1)
    h2 = jnp.maximum(
        jnp.dot(x.astype(dot_dtype), p["w2"].astype(dot_dtype),
                preferred_element_type=jnp.float32) + p["b2"], 0.0)
    return h2 @ p["w3"].T + p["b3"]


if __name__ == "__main__":
    # Small shapes consistent with the module's forward.
    batch, state_size, action_size = 16, 32, 8
    fcs1_units, fc2_units = 128, 128

    key = jax.random.PRNGKey(0)
    k_local, k_target, ks, ka, ks2, ka2 = jax.random.split(key, 6)
    p_local = init_params(k_local, state_size, action_size, fcs1_units, fc2_units)
    p_target = init_params(k_target, state_size, action_size, fcs1_units, fc2_units)

    state = jax.random.normal(ks, (batch, state_size), jnp.float32)
    action = jax.random.normal(ka, (batch, action_size), jnp.float32)
    next_state = jax.random.normal(ks2, (batch, state_size), jnp.float32)
    next_action = jax.random.normal(ka2, (batch, action_size), jnp.float32)

    # One fused launch: local-critic Q(s,a) and target-critic Q(s',a').
    kparams = stack_kernel_params([p_local, p_target])
    states = jnp.stack([state, next_state])      # (2, B, S)
    actions = jnp.stack([action, next_action])   # (2, B, A)

    q = critic_forward(states, actions, kparams)
    jax.block_until_ready(q)
    assert q.shape == (2, batch, 1)

    for e, (p, s, a) in enumerate([(p_local, state, action),
                                   (p_target, next_state, next_action)]):
        q_bf16 = reference_forward(s, a, p, dot_dtype=jnp.bfloat16)   # mirrors kernel numerics
        q_f32 = reference_forward(s, a, p, dot_dtype=jnp.float32)     # PyTorch-exact semantics
        assert jnp.allclose(q[e], q_bf16, atol=1e-3, rtol=1e-3), \
            f"eval {e}: mismatch vs bf16-mirrored reference"
        assert jnp.allclose(q[e], q_f32, atol=2e-2, rtol=2e-2), \
            f"eval {e}: drifted too far from f32 reference"

    print("KERNEL_OK")
</pallas_src>

<mosaic_0001>
module attributes {stable_mosaic.version = 11 : i64} {
  func.func @critic_kernel(%arg0: i32, %arg1: memref<1x16x32xf32, #tpu.memory_space<vmem>>, %arg2: memref<1x16x8xf32, #tpu.memory_space<vmem>>, %arg3: memref<1x32x128xbf16, #tpu.memory_space<vmem>>, %arg4: memref<1x1x128xf32, #tpu.memory_space<vmem>>, %arg5: memref<1x1x128xf32, #tpu.memory_space<vmem>>, %arg6: memref<1x128x128xbf16, #tpu.memory_space<vmem>>, %arg7: memref<1x8x128xbf16, #tpu.memory_space<vmem>>, %arg8: memref<1x1x128xf32, #tpu.memory_space<vmem>>, %arg9: memref<1x1x128xf32, #tpu.memory_space<vmem>>, %arg10: memref<2xf32, #tpu.memory_space<smem>>, %arg11: memref<1x16x1xf32, #tpu.memory_space<vmem>>) attributes {dimension_semantics = [#tpu.dimension_semantics<parallel>], iteration_bounds = array<i64: 2>, scalar_prefetch = 0 : i64, scratch_operands = 0 : i64, tpu.core_type = #tpu.core_type<tc>, window_params = [{transform_indices = @transform_0, window_bounds = array<i64: 1, 16, 32>}, {transform_indices = @transform_1, window_bounds = array<i64: 1, 16, 8>}, {transform_indices = @transform_2, window_bounds = array<i64: 1, 32, 128>}, {transform_indices = @transform_3, window_bounds = array<i64: 1, 1, 128>}, {transform_indices = @transform_4, window_bounds = array<i64: 1, 1, 128>}, {transform_indices = @transform_5, window_bounds = array<i64: 1, 128, 128>}, {transform_indices = @transform_6, window_bounds = array<i64: 1, 8, 128>}, {transform_indices = @transform_7, window_bounds = array<i64: 1, 1, 128>}, {transform_indices = @transform_8, window_bounds = array<i64: 1, 1, 128>}, {transform_indices = @transform_9, window_bounds = array<i64: 2>}, {transform_indices = @transform_10, window_bounds = array<i64: 1, 16, 1>}]} {
    %c0 = arith.constant 0 : index
    %c0_0 = arith.constant 0 : index
    %c0_1 = arith.constant 0 : index
    %0 = vector.load %arg1[%c0, %c0_0, %c0_1] : memref<1x16x32xf32, #tpu.memory_space<vmem>>, vector<1x16x32xf32>
    %1 = vector.shape_cast %0 : vector<1x16x32xf32> to vector<16x32xf32>
    %c0_2 = arith.constant 0 : index
    %c0_3 = arith.constant 0 : index
    %c0_4 = arith.constant 0 : index
    %2 = vector.load %arg2[%c0_2, %c0_3, %c0_4] : memref<1x16x8xf32, #tpu.memory_space<vmem>>, vector<1x16x8xf32>
    %3 = vector.shape_cast %2 : vector<1x16x8xf32> to vector<16x8xf32>
    %4 = arith.truncf %1 : vector<16x32xf32> to vector<16x32xbf16>
    %c0_5 = arith.constant 0 : index
    %c0_6 = arith.constant 0 : index
    %c0_7 = arith.constant 0 : index
    %5 = vector.load %arg3[%c0_5, %c0_6, %c0_7] : memref<1x32x128xbf16, #tpu.memory_space<vmem>>, vector<1x32x128xbf16>
    %6 = vector.shape_cast %5 : vector<1x32x128xbf16> to vector<32x128xbf16>
    %cst = arith.constant dense<0.000000e+00> : vector<16x128xf32>
    %7 = tpu.matmul %4, %6, %cst {dimension_numbers = #tpu.dot_dimension_numbers<[1], [0], [0], [1], [0, 0, 1, 1], [], []>} : vector<16x32xbf16>, vector<32x128xbf16>, vector<16x128xf32> -> vector<16x128xf32>
    %cst_8 = arith.constant dense<0.000000e+00> : vector<128xf32>
    %8 = vector.multi_reduction <add>, %7, %cst_8 [0] : vector<16x128xf32> to vector<128xf32>
    %9 = vector.shape_cast %8 : vector<128xf32> to vector<1x128xf32>
    %cst_9 = arith.constant 1.600000e+01 : f32
    %10 = vector.broadcast %cst_9 : f32 to vector<1x128xf32>
    %11 = arith.divf %9, %10 : vector<1x128xf32>
    %12 = vector.broadcast %11 : vector<1x128xf32> to vector<16x128xf32>
    %13 = arith.subf %7, %12 : vector<16x128xf32>
    %14 = arith.mulf %13, %13 : vector<16x128xf32>
    %cst_10 = arith.constant dense<0.000000e+00> : vector<128xf32>
    %15 = vector.multi_reduction <add>, %14, %cst_10 [0] : vector<16x128xf32> to vector<128xf32>
    %16 = vector.shape_cast %15 : vector<128xf32> to vector<1x128xf32>
    %cst_11 = arith.constant 1.600000e+01 : f32
    %17 = vector.broadcast %cst_11 : f32 to vector<1x128xf32>
    %18 = arith.divf %16, %17 : vector<1x128xf32>
    %c0_12 = arith.constant 0 : index
    %c0_13 = arith.constant 0 : index
    %c0_14 = arith.constant 0 : index
    %19 = vector.load %arg4[%c0_12, %c0_13, %c0_14] : memref<1x1x128xf32, #tpu.memory_space<vmem>>, vector<1x1x128xf32>
    %20 = vector.shape_cast %19 : vector<1x1x128xf32> to vector<1x128xf32>
    %cst_15 = arith.constant 9.99999974E-6 : f32
    %21 = vector.broadcast %cst_15 : f32 to vector<1x128xf32>
    %22 = arith.addf %18, %21 : vector<1x128xf32>
    %23 = math.rsqrt %22 : vector<1x128xf32>
    %24 = arith.mulf %20, %23 : vector<1x128xf32>
    %25 = vector.broadcast %24 : vector<1x128xf32> to vector<16x128xf32>
    %26 = arith.mulf %13, %25 : vector<16x128xf32>
    %c0_16 = arith.constant 0 : index
    %c0_17 = arith.constant 0 : index
    %c0_18 = arith.constant 0 : index
    %27 = vector.load %arg5[%c0_16, %c0_17, %c0_18] : memref<1x1x128xf32, #tpu.memory_space<vmem>>, vector<1x1x128xf32>
    %28 = vector.shape_cast %27 : vector<1x1x128xf32> to vector<1x128xf32>
    %29 = vector.broadcast %28 : vector<1x128xf32> to vector<16x128xf32>
    %30 = arith.addf %26, %29 : vector<16x128xf32>
    %cst_19 = arith.constant 0.000000e+00 : f32
    %31 = vector.broadcast %cst_19 : f32 to vector<16x128xf32>
    %32 = arith.maximumf %30, %31 : vector<16x128xf32>
    %33 = arith.truncf %32 : vector<16x128xf32> to vector<16x128xbf16>
    %c0_20 = arith.constant 0 : index
    %c0_21 = arith.constant 0 : index
    %c0_22 = arith.constant 0 : index
    %34 = vector.load %arg6[%c0_20, %c0_21, %c0_22] : memref<1x128x128xbf16, #tpu.memory_space<vmem>>, vector<1x128x128xbf16>
    %35 = vector.shape_cast %34 : vector<1x128x128xbf16> to vector<128x128xbf16>
    %cst_23 = arith.constant dense<0.000000e+00> : vector<16x128xf32>
    %36 = tpu.matmul %33, %35, %cst_23 {dimension_numbers = #tpu.dot_dimension_numbers<[1], [0], [0], [1], [0, 0, 1, 1], [], []>} : vector<16x128xbf16>, vector<128x128xbf16>, vector<16x128xf32> -> vector<16x128xf32>
    %37 = arith.truncf %3 : vector<16x8xf32> to vector<16x8xbf16>
    %c0_24 = arith.constant 0 : index
    %c0_25 = arith.constant 0 : index
    %c0_26 = arith.constant 0 : index
    %38 = vector.load %arg7[%c0_24, %c0_25, %c0_26] : memref<1x8x128xbf16, #tpu.memory_space<vmem>>, vector<1x8x128xbf16>
    %39 = vector.shape_cast %38 : vector<1x8x128xbf16> to vector<8x128xbf16>
    %cst_27 = arith.constant dense<0.000000e+00> : vector<16x128xf32>
    %40 = tpu.matmul %37, %39, %cst_27 {dimension_numbers = #tpu.dot_dimension_numbers<[1], [0], [0], [1], [0, 0, 1, 1], [], []>} : vector<16x8xbf16>, vector<8x128xbf16>, vector<16x128xf32> -> vector<16x128xf32>
    %41 = arith.addf %36, %40 : vector<16x128xf32>
    %c0_28 = arith.constant 0 : index
    %c0_29 = arith.constant 0 : index
    %c0_30 = arith.constant 0 : index
    %42 = vector.load %arg8[%c0_28, %c0_29, %c0_30] : memref<1x1x128xf32, #tpu.memory_space<vmem>>, vector<1x1x128xf32>
    %43 = vector.shape_cast %42 : vector<1x1x128xf32> to vector<1x128xf32>
    %44 = vector.broadcast %43 : vector<1x128xf32> to vector<16x128xf32>
    %45 = arith.addf %41, %44 : vector<16x128xf32>
    %cst_31 = arith.constant 0.000000e+00 : f32
    %46 = vector.broadcast %cst_31 : f32 to vector<16x128xf32>
    %47 = arith.maximumf %45, %46 : vector<16x128xf32>
    %c0_32 = arith.constant 0 : index
    %c0_33 = arith.constant 0 : index
    %c0_34 = arith.constant 0 : index
    %48 = vector.load %arg9[%c0_32, %c0_33, %c0_34] : memref<1x1x128xf32, #tpu.memory_space<vmem>>, vector<1x1x128xf32>
    %49 = vector.shape_cast %48 : vector<1x1x128xf32> to vector<1x128xf32>
    %50 = vector.broadcast %49 : vector<1x128xf32> to vector<16x128xf32>
    %51 = arith.mulf %47, %50 : vector<16x128xf32>
    %cst_35 = arith.constant dense<0.000000e+00> : vector<16xf32>
    %52 = vector.multi_reduction <add>, %51, %cst_35 [1] : vector<16x128xf32> to vector<16xf32>
    %53 = vector.shape_cast %52 : vector<16xf32> to vector<16x1xf32>
    %54 = arith.index_cast %arg0 : i32 to index
    %55 = memref.load %arg10[%54] : memref<2xf32, #tpu.memory_space<smem>>
    %56 = vector.broadcast %55 : f32 to vector<16x1xf32>
    %57 = arith.addf %53, %56 : vector<16x1xf32>
    %c0_36 = arith.constant 0 : index
    %c0_37 = arith.constant 0 : index
    %c0_38 = arith.constant 0 : index
    %58 = vector.load %arg11[%c0_36, %c0_37, %c0_38] : memref<1x16x1xf32, #tpu.memory_space<vmem>>, vector<1x16x1xf32>
    %59 = vector.shape_cast %58 : vector<1x16x1xf32> to vector<16x1xf32>
    %60 = vector.shape_cast %57 : vector<16x1xf32> to vector<1x16x1xf32>
    tpu.vector_store %arg11[%c0_36, %c0_37, %c0_38], %60 {strides = array<i32>} : memref<1x16x1xf32, #tpu.memory_space<vmem>>, vector<1x16x1xf32>,
    return
  }
  func.func @transform_0(%arg0: i32) -> (i32, i32, i32) {
    %c0_i32 = arith.constant 0 : i32
    %c0_i32_0 = arith.constant 0 : i32
    %c0_i32_1 = arith.constant 0 : i32
    return %arg0, %c0_i32, %c0_i32_0 : i32, i32, i32
  }
  func.func @transform_1(%arg0: i32) -> (i32, i32, i32) {
    %c0_i32 = arith.constant 0 : i32
    %c0_i32_0 = arith.constant 0 : i32
    %c0_i32_1 = arith.constant 0 : i32
    return %arg0, %c0_i32, %c0_i32_0 : i32, i32, i32
  }
  func.func @transform_2(%arg0: i32) -> (i32, i32, i32) {
    %c0_i32 = arith.constant 0 : i32
    %c0_i32_0 = arith.constant 0 : i32
    %c0_i32_1 = arith.constant 0 : i32
    return %arg0, %c0_i32, %c0_i32_0 : i32, i32, i32
  }
  func.func @transform_3(%arg0: i32) -> (i32, i32, i32) {
    %c0_i32 = arith.constant 0 : i32
    %c0_i32_0 = arith.constant 0 : i32
    %c0_i32_1 = arith.constant 0 : i32
    return %arg0, %c0_i32, %c0_i32_0 : i32, i32, i32
  }
  func.func @transform_4(%arg0: i32) -> (i32, i32, i32) {
    %c0_i32 = arith.constant 0 : i32
    %c0_i32_0 = arith.constant 0 : i32
    %c0_i32_1 = arith.constant 0 : i32
    return %arg0, %c0_i32, %c0_i32_0 : i32, i32, i32
  }
  func.func @transform_5(%arg0: i32) -> (i32, i32, i32) {
    %c0_i32 = arith.constant 0 : i32
    %c0_i32_0 = arith.constant 0 : i32
    %c0_i32_1 = arith.constant 0 : i32
    return %arg0, %c0_i32, %c0_i32_0 : i32, i32, i32
  }
  func.func @transform_6(%arg0: i32) -> (i32, i32, i32) {
    %c0_i32 = arith.constant 0 : i32
    %c0_i32_0 = arith.constant 0 : i32
    %c0_i32_1 = arith.constant 0 : i32
    return %arg0, %c0_i32, %c0_i32_0 : i32, i32, i32
  }
  func.func @transform_7(%arg0: i32) -> (i32, i32, i32) {
    %c0_i32 = arith.constant 0 : i32
    %c0_i32_0 = arith.constant 0 : i32
    %c0_i32_1 = arith.constant 0 : i32
    return %arg0, %c0_i32, %c0_i32_0 : i32, i32, i32
  }
  func.func @transform_8(%arg0: i32) -> (i32, i32, i32) {
    %c0_i32 = arith.constant 0 : i32
    %c0_i32_0 = arith.constant 0 : i32
    %c0_i32_1 = arith.constant 0 : i32
    return %arg0, %c0_i32, %c0_i32_0 : i32, i32, i32
  }
  func.func @transform_9(%arg0: i32) -> i32 {
    %c0_i32 = arith.constant 0 : i32
    %c0_i32_0 = arith.constant 0 : i32
    return %c0_i32 : i32
  }
  func.func @transform_10(%arg0: i32) -> (i32, i32, i32) {
    %c0_i32 = arith.constant 0 : i32
    %c0_i32_0 = arith.constant 0 : i32
    %c0_i32_1 = arith.constant 0 : i32
    return %arg0, %c0_i32, %c0_i32_0 : i32, i32, i32
  }
}

</mosaic_0001>

<bundles_post_ra>
// kernel: tpu_custom_call.1
= control target key start
LH: loop header
LB: loop body
LE: loop exit
PB: predicated region body
PF: predicated region fallthrough
CT: control target
= control target key end

     0   :  { %s1581_s0 = inlined_call_operand.vmem [shape: f32[2,16,32], index: 0, kind: input, shape index: {}]   ;;  %s1582_s1 = inlined_call_operand.vmem [shape: f32[2,16,8], index: 1, kind: input, shape index: {}]   ;;  %s1583_s2 = inlined_call_operand.hbm [shape: bf16[2,32,128], index: 2, kind: input, shape index: {}]   ;;  %s1584_s3 = inlined_call_operand.vmem [shape: f32[2,1,128], index: 3, kind: input, shape index: {}]   ;;  %s1585_s4 = inlined_call_operand.vmem [shape: f32[2,1,128], index: 4, kind: input, shape index: {}]   ;;  %s1586_s5 = inlined_call_operand.hbm [shape: bf16[2,128,128], index: 5, kind: input, shape index: {}]   ;;  %s1587_s6 = inlined_call_operand.vmem [shape: bf16[2,8,128], index: 6, kind: input, shape index: {}]   ;;  %s1588_s7 = inlined_call_operand.vmem [shape: f32[2,1,128], index: 7, kind: input, shape index: {}]   ;;  %s1589_s8 = inlined_call_operand.vmem [shape: f32[2,1,128], index: 8, kind: input, shape index: {}]   ;;  %s1590_s9 = inlined_call_operand.vmem [shape: f32[2], index: 9, kind: input, shape index: {}]   ;;  %s1591_s10 = inlined_call_operand.vmem [shape: f32[2,16,1], index: 10, kind: output, shape index: {}]  }
   0x1   :  { %1595 = sst [smem:[#allocation13_spill]] %s1583_s2 }
   0x2   :  { %1596 = sst [smem:[#allocation14_spill]] %s1590_s9 }
   0x3   :  { %15 = vsyncpa [#allocation3], 0 }
   0x4   :  { %17 = vsyncpa [#allocation3 + $0x1], 0 }
   0x5   :  { %18 = vsyncpa [#allocation6], 0 }
   0x6   :  { %20 = vsyncpa [#allocation6 + $0x1], 0 }
   0x7   :  { %21 = vsyncpa [#allocation4], 0  ;;  %s1359_s13 = smov 0   ;;  %s1361_s14 = smov 0  }
   0x8   :  { %s1363_s15 = smov 0   ;;  %s1365_s16 = smov 0  }
   0x9 LB: > { %1597 = sst [smem:[#allocation11_spill]] %s1291_s15  ;;  %s1378_s17 = sadd.s32 4294967295, %s1295_s16   ;;  %s1295_s16 = sphi %s1365_s16, %s1611_s16   ;;  %s1291_s15 = sphi %s1363_s15, %s1608_s15   ;;  %s1287_s14 = sphi %s1361_s14, %s1610_s14   ;;  %s1283_s13 = sphi %s1359_s13, %s1609_s13  }
   0xa   : > { %s1381_s18 = sadd.s32 1, %s1295_s16   ;;  %s86_s20 = sadd.s32 1, %s1291_s15 }
   0xb   : > { %s83_s19 = ssub.s32 %s1295_s16, %s1381_s18  ;;  %p93_p1 = scmp.ne.s32.totalorder %s1291_s15, %s1287_s14 }
   0xc   : > { %p84_p0 = scmp.eq.s32.totalorder %s83_s19, 0  ;;  %p94_p2 = scmp.eq.s32.totalorder %s1295_s16, 0 }
   0xd   : > { %p99_p3 = scmp.ne.s32.totalorder %s1287_s14, %s1283_s13  ;;  %p100_p5 = scmp.eq.s32.totalorder %s1378_s17, 0 }
   0xe   : > { %s1391_s21 = scalar_select %p84_p0, %s1291_s15, %s86_s20  }
   0xf   : > { %p95_p4 = por %p94_p2, %p93_p1  ;;  %p1021_p6 = scmp.ge.s32.totalorder %s1295_s16, 1 }
  0x10   : > { %1598 = sst [smem:[#allocation12_spill]] %s1391_s21  ;;  %p313_p7 = scmp.lt.s32.totalorder %s1295_s16, 3 }
  0x11   : > { %p1398_p8 = por %p100_p5, %p99_p3  ;;  %s1601_s9 = sld [smem:[#allocation14_spill]] }
  0x12   : > { %p1402_p9 = pnand %p1021_p6, %p313_p7  ;;  %p1131_p11 = scmp.lt.s32.totalorder %s1295_s16, 2 }
  0x13   : > { %s1599_s22 = scalar_select %p1398_p8, 1, 0 }
  0x14   : > { %s1600_s23 = scalar_select %p1402_p9, 1, 0 }
  0x15   : > { %p1119_p10 = pneg %p1402_p9  ;;  %s1413_s27 = sand.u32 1, %s1291_s15  }
  0x16   : > { %p1421_p13 = pnand %p1131_p11, %p95_p4  ;;  %s1024_s30 = sshll.u32 %s1413_s27, 4 }
  0x17   : > { %s326_s26 = sshll.u32 %s1601_s9, 4  ;;  %p1417_p12 = pnand %p1119_p10, %p100_p5  ;;  %s327_s26 = int_to_ptr.vmem [resolvable:$true] %s326_s26 }
  0x18   : > { %s1182_s11 = scalar_lea.vmem %s327_s26, 16  ;;  %p1190_p6 = scmp.lt.s32.totalorder %s327_s26, %s327_s26 }
  0x19   : > { %p1183_p0 = scmp.ne.s32.totalorder %s327_s26, %s1182_s11  ;;  %p1184_p1 = pneg %p1417_p12 }
  0x1a   : > { %p1191_p7 = scmp.lt.s32.totalorder %s1182_s11, %s1182_s11 }
  0x1b   : > { %p1185_p2 = pnand %p1184_p1, %p1183_p0 }
  0x1c   : > { %p1192_p8 = por %p1191_p7, %p1190_p6 }
  0x1d   : > { %p1186_p3 = pneg %p1185_p2 }
  0x1f   : > { %p1193_p9 = pnand %p1192_p8, %p1186_p3 }
  0x21   : > { %1196 = shalt.err (!%p1193_p9)
}
  0x22   : > { %s1297_s12 = smov [#allocation7]   ;;  %s1058_s13 = sshll.u32 %s1295_s16, 8 }
  0x23   : > { %1122 = dma.vmem_to_smem (!%p1417_p12), %s327_s26, 16, %s1297_s12, [#allocation4]  }
  0x24   : > { %s1604_s2 = sld [smem:[#allocation13_spill]]  ;;  %s357_s25 = scalar_lea.vmem [#allocation2], %s1024_s30 }
  0x25   : > { %s364_s11 = sshll.u32 %s357_s25, 4  ;;  %s354_s9 = scalar_lea.sflag [#allocation3], %s1413_s27  ;;  %s1436_s11 = int_to_ptr.vmem [resolvable:$true] %s364_s11 }
  0x26   : > { %p1199_p8 = pneg %p1421_p13 }
  0x2a   : > { %s1434_s24 = scalar_lea.hbm %s1604_s2, %s1058_s13  ;;  %s1202_s13 = scalar_lea.hbm %s1604_s2, 512 }
  0x2b   : > { %s1197_s28 = scalar_lea.hbm %s1434_s24, 256  ;;  %p1203_p11 = scmp.lt.s32.totalorder %s1434_s24, %s1604_s2 }
  0x2c   : > { %p1198_p4 = scmp.ne.s32.totalorder %s1434_s24, %s1197_s28  ;;  %p1204_p12 = scmp.lt.s32.totalorder %s1202_s13, %s1197_s28 }
  0x2e   : > { %p1200_p9 = pnand %p1199_p8, %p1198_p4  ;;  %p1205_p0 = por %p1204_p12, %p1203_p11 }
  0x30   : > { %p1201_p10 = pneg %p1200_p9 }
  0x32   : > { %p1206_p1 = pnand %p1205_p0, %p1201_p10 }
  0x34   : > { %1209 = shalt.err (!%p1206_p1)
}
  0x35   : > { %s1210_s30 = scalar_lea.vmem %s1436_s11, 256  ;;  %s1298_s25 = smov [#allocation2]  }
  0x36   : > { %p1211_p2 = scmp.ne.s32.totalorder %s1436_s11, %s1210_s30  ;;  %s1215_s26 = sshll.u32 %s1298_s25, 4  ;;  %s1216_s26 = int_to_ptr.vmem [resolvable:$false] %s1215_s26 }
  0x37   : > { %s1217_s12 = scalar_lea.vmem %s1216_s26, 512  ;;  %p1218_p7 = scmp.lt.s32.totalorder %s1436_s11, %s1216_s26 }
  0x38   : > { %p1213_p3 = pnand %p1211_p2, %p1199_p8  ;;  %p1219_p4 = scmp.lt.s32.totalorder %s1217_s12, %s1210_s30 }
  0x3a   : > { %p1214_p6 = pneg %p1213_p3  ;;  %p1220_p9 = por %p1219_p4, %p1218_p7 }
  0x3c   : > { %p1221_p11 = pnand %p1220_p9, %p1214_p6 }
  0x3e   : > { %1224 = shalt.err (!%p1221_p11)
}
  0x3f   : > { %s1299_s28 = smov 64   ;;  %s1300_s13 = smov 4  }
  0x40   : > { %1126 = dma.hbm_to_vmem [thread:$0]  (!%p1421_p13), %s1434_s24, 256, %s1436_s11, %s354_s9, %s1299_s28, %s1299_s28, %s1300_s13  }
  0x41   : > { %s1027_s19 = sshll.u32 %s1413_s27, 6  ;;  %s1059_s20 = sshll.u32 %s1295_s16, 10 }
  0x42   : > { %s1473_s26 = scalar_lea.hbm %s1586_s5, %s1059_s20  ;;  %s390_s12 = scalar_lea.vmem [#allocation5], %s1027_s19 }
  0x43   : > { %s397_s2 = sshll.u32 %s390_s12, 4  ;;  %s387_s21 = scalar_lea.sflag [#allocation6], %s1413_s27  ;;  %s1475_s2 = int_to_ptr.vmem [resolvable:$true] %s397_s2 }
  0x44   : > { %s1225_s15 = scalar_lea.hbm %s1473_s26, 1024  ;;  %s1230_s24 = scalar_lea.hbm %s1586_s5, 2048 }
  0x45   : > { %p1226_p10 = scmp.ne.s32.totalorder %s1473_s26, %s1225_s15  ;;  %p1231_p1 = scmp.lt.s32.totalorder %s1473_s26, %s1586_s5 }
  0x46   : > { %p1232_p2 = scmp.lt.s32.totalorder %s1230_s24, %s1225_s15 }
  0x47   : > { %p1228_p12 = pnand %p1226_p10, %p1199_p8 }
  0x48   : > { %p1233_p3 = por %p1232_p2, %p1231_p1 }
  0x49   : > { %p1229_p0 = pneg %p1228_p12 }
  0x4b   : > { %p1234_p6 = pnand %p1233_p3, %p1229_p0 }
  0x4d   : > { %1237 = shalt.err (!%p1234_p6)
}
  0x4e   : > { %s1238_s27 = scalar_lea.vmem %s1475_s2, 1024  ;;  %s1301_s19 = smov [#allocation5]  }
  0x4f   : > { %p1239_p7 = scmp.ne.s32.totalorder %s1475_s2, %s1238_s27  ;;  %s1243_s30 = sshll.u32 %s1301_s19, 4  ;;  %s1244_s30 = int_to_ptr.vmem [resolvable:$false] %s1243_s30 }
  0x50   : > { %s1245_s25 = scalar_lea.vmem %s1244_s30, 2048  ;;  %p1246_p11 = scmp.lt.s32.totalorder %s1475_s2, %s1244_s30 }
  0x51   : > { %p1241_p4 = pnand %p1239_p7, %p1199_p8  ;;  %p1247_p10 = scmp.lt.s32.totalorder %s1245_s25, %s1238_s27 }
  0x53   : > { %p1242_p9 = pneg %p1241_p4  ;;  %p1248_p12 = por %p1247_p10, %p1246_p11 }
  0x55   : > { %p1249_p1 = pnand %p1248_p12, %p1242_p9 }
  0x57   : > { %1252 = shalt.err (!%p1249_p1)
}
  0x58   : > { %1129 = dma.hbm_to_vmem [thread:$0]  (!%p1421_p13), %s1473_s26, 1024, %s1475_s2, %s387_s21, %s1299_s28, %s1299_s28, %s1300_s13  }
  0x59   : > { %p1605_p8 = scmp.ne.s32.totalorder %s1600_s23, 0 }
  0x5a   : > { %s430_s15 = sand.u32 (!%p1605_p8), 1, %s1287_s14   ;;  %p1606_p0 = scmp.ne.s32.totalorder (!%p1605_p8), %s1599_s22, 0 }
  0x5b   : > { %428 = sbr.rel (%p1605_p8) target bundleno = 720 (0x2d0), region = 60  ;;  %s1031_s12 = sshll.u32 (!%p1605_p8), %s430_s15, 4 }
  0x5c   : > { %s431_s9 = scalar_lea.sflag (!%p1605_p8), [#allocation3], %s430_s15  ;;  %s434_s16 = scalar_lea.vmem (!%p1605_p8), [#allocation2], %s1031_s12 }
  0x60   : > { %1270 = dma.done.wait (%p1606_p0), %s431_s9, 256  }
  0x61   : > { %1272 = vsyncadd (%p1606_p0), %s431_s9, 4294967040  ;;  %s1032_s29 = sshll.u32 %s430_s15, 6  ;;  %s440_s24 = scalar_lea.sflag [#allocation6], %s430_s15 }
  0x62   : > { %s1510_s11 = scalar_lea.vmem [#allocation5], %s1032_s29 }
  0x63   : > { %1274 = dma.done.wait (%p1606_p0), %s440_s24, 1024  }
  0x64   : > { %1276 = vsyncadd (%p1606_p0), %s440_s24, 4294966272 }
  0x65   : > { %1278 = dma.done.wait (%p100_p5), [#allocation4], 16  }
  0x66   : > { %1280 = vsyncadd (%p100_p5), [#allocation4], 4294967280 }
  0x67   : > { %452 = sfence }
  0x68   : > { %v1170_v0 = vld [vmem:[%s434_s16 + $0x8] sm:$0xff]   ;;  %v1302_v1 = vmov 0.0   ;;  %v1171_v2 = vld [vmem:[%s434_s16] sm:$0xff]   ;;  %vm1303_vm0 = vmmov 0   ;;  %p516_p13 = scmp.lt.s32.totalorder %s1378_s17, 1  ;;  %vm569_vm1 = vcmask 261120   ;;  %v640_v44 = vlaneseq }
  0x69   : > { %1077 = vmatprep.subr.bf16.mxu0 %v1302_v1  ;;  %1091 = vmatprep.subr.bf16.mxu1 %v1302_v1  ;;  %v1172_v6 = vld [vmem:[%s1510_s11 + $0x38] sm:$0xff]   ;;  %v1173_v7 = vld [vmem:[%s1510_s11 + $0x30] sm:$0xff]   ;;  %v1174_v8 = vld [vmem:[%s1510_s11 + $0x28] sm:$0xff]   ;;  %vm681_vm2 = vcmask 1043456   ;;  %vm677_vm3 = vcmask 64512   ;;  %s839_s20 = sld [smem:[#allocation7 + %s1378_s17]] }
  0x6a   : > { %1078 = vmatpush3.bf16.msra.mxu0 %v1170_v0  ;;  %1081 = vmatprep.mubr.msk.bf16.mxu0 %vm1303_vm0, %v1302_v1  ;;  %s1522_s2 = scalar_select %p516_p13, %s1378_s17, 1  ;;  %v1175_v9 = vld [vmem:[%s1510_s11 + $0x20] sm:$0xff]   ;;  %v1176_v10 = vld [vmem:[%s1510_s11 + $0x18] sm:$0xff]   ;;  %v1177_v11 = vld [vmem:[%s1510_s11 + $0x10] sm:$0xff]   ;;  %v641_v45 = vshrl.u32 %v640_v44, 7  ;;  %vm843_vm4 = vcmask 7168  }
  0x6b   : > { %1079 = vmatprep.subr.bf16.mxu0 %v1302_v1  ;;  %1107 = vmatprep.mubr.msk.bf16.mxu1 %vm1303_vm0, %v1302_v1  ;;  %v1178_v14 = vld [vmem:[%s1510_s11 + $0x8] sm:$0xff]   ;;  %v1179_v18 = vld [vmem:[%s1510_s11] sm:$0xff]  }
  0x6c   : > { %s1525_s21 = sshll.u32 %s1522_s2, 4  ;;  %1092 = vmatpush3.bf16.msra.mxu1 %v1172_v6  ;;  %s1038_s13 = sshll.u32 %s1522_s2, 2  ;;  %v642_v47 = vsub.s32 0, %v641_v45 }
  0x6d   : > { %s520_s28 = scalar_lea.vmem %s1581_s0, %s1525_s21  ;;  %1093 = vmatprep.subr.bf16.mxu1 %v1302_v1  ;;  %s535_s27 = scalar_lea.vmem %s1587_s6, %s1038_s13 }
  0x6e   : > { %1080 = vmatpush3.bf16.msra.mxu0 %v1171_v2  ;;  %v548_v3 = vld [vmem:[%s520_s28] sm:$0xff]  ;;  %v549_v4 = vld [vmem:[%s520_s28 + $0x8] sm:$0xff]  ;;  %s525_s25 = scalar_lea.vmem %s1582_s1, %s1525_s21  ;;  %s528_s9 = scalar_lea.vmem %s1584_s3, %s1522_s2 }
  0x6f   : > { %1085 = vmatprep.subr.bf16.mxu0 %v1302_v1  ;;  %v552_v5 = vpack.c.bf16 %v549_v4, %v548_v3  ;;  %v676_v12 = vld [vmem:[%s535_s27] sm:$0xf]  ;;  %v551_v16 = vld [vmem:[%s525_s25 + $0x8] sm:$0xff]  ;;  %s531_s24 = scalar_lea.vmem %s1585_s4, %s1522_s2  ;;  %s538_s23 = scalar_lea.vmem %s1588_s7, %s1522_s2 }
  0x70   : > { %1094 = vmatpush3.bf16.msra.mxu1 %v1173_v7  ;;  %v683_v13 = vsel %vm681_vm2, %v676_v12, 0  ;;  %v550_v15 = vld [vmem:[%s525_s25] sm:$0xff]  ;;  %s541_s26 = scalar_lea.vmem %s1589_s8, %s1522_s2  ;;  %s546_s2 = scalar_lea.vmem %s1591_s10, %s1525_s21 }
  0x71   : > { %1082 = vmatmul.mubr.msk.bf16.vlgmr.msra.gmra.mxu0 %vm569_vm1, %v552_v5  ;;  %1095 = vmatprep.subr.bf16.mxu1 %v1302_v1  ;;  %v675_v17 = vpack.c.bf16 %v551_v16, %v550_v15  ;;  %v635_v46 = vld [vmem:[%s528_s9] sm:$0x1] }
  0x72   : > { %1087 = vmatprep.mubr.msk.bf16.mxu0 %vm1303_vm0, %v1302_v1  ;;  %1086 = vmatpush3.bf16.msra.mxu0 %v683_v13  ;;  %v1044_v51 = vld [vmem:[%s531_s24] ss:$0 sm:$0xff]  ;;  %v840_v13 = vstv %s839_s20 }
  0x73   : > { %v1054_v0 = vld [vmem:[%s538_s23] ss:$0 sm:$0xff] }
  0x74   : > { %1096 = vmatpush3.bf16.msra.mxu1 %v1174_v8  ;;  %v1055_v5 = vld [vmem:[%s541_s26] ss:$0 sm:$0xff] }
  0x75   : > { %1097 = vmatprep.subr.bf16.mxu1 %v1302_v1 }
  0x78   : > { %1098 = vmatpush3.bf16.msra.mxu1 %v1175_v9 }
  0x79   : > { %1099 = vmatprep.subr.bf16.mxu1 %v1302_v1  ;;  %1088 = vmatmul.mubr.msk.bf16.vlgmr.msra.gmra.mxu0 %vm677_vm3, %v675_v17 }
  0x7c   : > { %1100 = vmatpush3.bf16.msra.mxu1 %v1176_v10 }
  0x7d   : > { %1101 = vmatprep.subr.bf16.mxu1 %v1302_v1 }
  0x80   : > { %1102 = vmatpush3.bf16.msra.mxu1 %v1177_v11 }
  0x81   : > { %1103 = vmatprep.subr.bf16.mxu1 %v1302_v1 }
  0x84   : > { %1104 = vmatpush3.bf16.msra.mxu1 %v1178_v14 }
  0x85   : > { %1105 = vmatprep.subr.bf16.mxu1 %v1302_v1 }
  0x88   : > { %1106 = vmatpush3.bf16.msra.mxu1 %v1179_v18 }
 0x131   : > { %v607_v19 = vpop.f32.mrf.mxu0 }
 0x133   : > { %v1083_v20 = vpop.f32.mrf.mxu0 }
 0x135   : > { %v610_v21 = vpop.f32.mrf.mxu0 }
 0x136   : > { %v614_v22 = vadd.f32 %v610_v21, %v607_v19 }
 0x137   : > { %v1084_v23 = vpop.f32.mrf.mxu0 }
 0x138   : > { %v615_v24 = vrot.slane %v614_v22, 4 }
 0x139   : > { %v719_v59 = vpop.f32.mrf.mxu0 }
 0x13a   : > { %v616_v25 = vadd.f32 %v615_v24, %v614_v22 }
 0x13b   : > { %v1089_v60 = vpop.f32.mrf.mxu0 }
 0x13c   : > { %v617_v26 = vrot.slane %v616_v25, 2 }
 0x13d   : > { %v722_v61 = vpop.f32.mrf.mxu0 }
 0x13e   : > { %v618_v27 = vadd.f32 %v617_v26, %v616_v25 }
 0x13f   : > { %v1090_v62 = vpop.f32.mrf.mxu0 }
 0x140   : > { %v619_v28 = vrot.slane %v618_v27, 1 }
 0x142   : > { %v620_v29 = vadd.f32 %v619_v28, %v618_v27 }
 0x144   : > { %v622_v30 = vmul.f32 0.0625, %v620_v29 }
 0x146   : > { %v623_v31 = vsub.f32 %v607_v19, %v622_v30  ;;  %v624_v32 = vsub.f32 %v610_v21, %v622_v30 }
 0x148   : > { %v625_v33 = vmul.f32 %v623_v31, %v623_v31  ;;  %v626_v34 = vmul.f32 %v624_v32, %v624_v32 }
 0x14a   : > { %v627_v35 = vadd.f32 %v626_v34, %v625_v33 }
 0x14c   : > { %v628_v36 = vrot.slane %v627_v35, 4 }
 0x14e   : > { %v629_v37 = vadd.f32 %v628_v36, %v627_v35 }
 0x150   : > { %v630_v38 = vrot.slane %v629_v37, 2 }
 0x152   : > { %v631_v39 = vadd.f32 %v630_v38, %v629_v37 }
 0x154   : > { %v632_v40 = vrot.slane %v631_v39, 1 }
 0x156   : > { %v633_v41 = vadd.f32 %v632_v40, %v631_v39 }
 0x158   : > { %v634_v42 = vmul.f32 0.0625, %v633_v41 }
 0x15a   : > { %v636_v43 = vadd.f32 1e-05, %v634_v42 }
 0x15c   : > { %1180 = vrsqrt.f32 %v636_v43 }
 0x169   : > { %v1181_v48 = vpop.eup %1180 }
 0x16a   : > { %v638_v49 = vmul.f32 %v1181_v48, %v635_v46 }
 0x16c   : > { %v643_v50 = vrot.slane %v638_v49, %v642_v47 }
 0x16e   : > { %v645_v52 = vmul.f32 %v643_v50, %v623_v31  ;;  %v646_v53 = vmul.f32 %v643_v50, %v624_v32 }
 0x170   : > { %v655_v54 = vadd.f32 %v1044_v51, %v646_v53  ;;  %v654_v55 = vadd.f32 %v1044_v51, %v645_v52 }
 0x172   : > { %v656_v56 = vmax.f32 %v654_v55, 0.0  ;;  %v657_v57 = vmax.f32 %v655_v54, 0.0 }
 0x174   : > { %v658_v58 = vpack.c.bf16 %v657_v57, %v656_v56 }
 0x176   : > { %1108 = vmatmul.mubr.bf16.vlgmr.msra.gmra.mxu1 %v658_v58 }
 0x236   : > { %v808_v63 = vpop.f32.mrf.mxu1 }
 0x237   : > { %v809_v1 = vadd.f32 %v808_v63, %v719_v59 }
 0x238   : > { %v1109_v2 = vpop.f32.mrf.mxu1 }
 0x239   : > { %v822_v3 = vadd.f32 %v1054_v0, %v809_v1 }
 0x23a   : > { %v811_v4 = vpop.f32.mrf.mxu1 }
 0x23b   : > { %v812_v6 = vadd.f32 %v811_v4, %v722_v61  ;;  %v824_v7 = vmax.f32 %v822_v3, 0.0 }
 0x23c   : > { %v1110_v8 = vpop.f32.mrf.mxu1 }
 0x23d   : > { %v823_v9 = vadd.f32 %v1054_v0, %v812_v6  ;;  %v833_v10 = vmul.f32 %v1055_v5, %v824_v7 }
 0x23f   : > { %v825_v11 = vmax.f32 %v823_v9, 0.0  ;;  %835 = vadd.xlane.f32.xlu0 %v833_v10 }
 0x241   : > { %v834_v12 = vmul.f32 %v1055_v5, %v825_v11 }
 0x243   : > { %837 = vadd.xlane.f32.xlu0 %v834_v12 }
 0x2c8   : > { %v836_v14 = vpop.xlane.xlu0 %835 }
 0x2c9   : > { %v841_v15 = vadd.f32 %v840_v13, %v836_v14 }
 0x2cb   : > { %844 = vst.msk [vmem:[%s546_s2] sm:$0xff] %vm843_vm4, %v841_v15 }
 0x2cc   : > { %v838_v16 = vpop.xlane.xlu0 %837 }
 0x2cd   : > { %v842_v17 = vadd.f32 %v840_v13, %v838_v16 }
 0x2cf   : > { %845 = vst.msk [vmem:[%s546_s2 + $0x8] sm:$0xff] %vm843_vm4, %v842_v17 }
 0x2d0 PF: > { %s1607_s30 = sld [smem:[#allocation11_spill]]  ;;  %p24_p5 = scmp.ge.s32.totalorder %s1381_s18, 4  }
 0x2d1   : > { %s1608_s15 = sld [smem:[#allocation12_spill]]  ;;  %s1609_s13 = smov %s1287_s14 }
 0x2d2   : > { %s1611_s16 = smov %s1381_s18  ;;  %26 = sbr.rel (!%p24_p5) target bundleno = 9 (0x9), region = 139 }
 0x2d6   : > { %s1610_s14 = smov %s1607_s30 }
 0x2d7   :  { %867 = vsyncpa [#allocation3], 1 }
 0x2d8   :  { %869 = vsyncpa [#allocation3 + $0x1], 1 }
 0x2d9   :  { %870 = vsyncpa [#allocation6], 1 }
 0x2da   :  { %872 = vsyncpa [#allocation6 + $0x1], 1 }
 0x2db   :  { %873 = vsyncpa [#allocation4], 1 }
 0x2dc   :  { %875 = vsyncpa [#allocation4 + $0x1], 1 }

</bundles_post_ra>
